<compile_context>
chip_gen: v6e
topology: v6e:2x2x1
jax: 0.10.0
libtpu: 0.0.40
codegen_flags: <defaults>
</compile_context>

<pallas_src>
import jax
import jax.numpy as jnp
from jax import lax
from jax.experimental import pallas as pl
from jax.experimental.pallas import tpu as pltpu

_MIB = 1024 * 1024


def _downsample_kernel(x_ref, w_ref, b_ref, o_ref):
    """One (batch, row-tile) grid step.

    x_ref : (1, TH, Wo_pad, 9*Cin)  folded tap tensor (bf16)
    w_ref : (9*Cin, Cout_p)         folded weights, row index = (kh*3+kw)*Cin + ci (bf16)
    b_ref : (1, Cout_p)             bias (f32)
    o_ref : (1, TH, Wo_pad, Cout_p) output tile
    """
    _, th, wo, cout_p = o_ref.shape
    kc = w_ref.shape[0]

    # Wo_pad % 16 == 0  =>  this reshape is a free relabel (no VMEM relayout).
    lhs = x_ref[0].reshape(th * wo, kc)
    acc = jnp.dot(lhs, w_ref[...], preferred_element_type=jnp.float32)
    acc = acc + b_ref[...]                       # f32 bias add (VPU-safe on v5e)
    o_ref[0] = acc.reshape(th, wo, cout_p).astype(o_ref.dtype)


def _vmem_config():
    """(tiling budget, vmem_limit_bytes, physical capacity) per TPU generation."""
    cap = None
    try:
        cap = getattr(pltpu.get_tpu_info(), "vmem_capacity_bytes", None)
    except Exception:
        cap = None
    if cap is None:
        cap = 64 * _MIB                              # assume the smallest (v7x-like)
    if cap >= 100 * _MIB:                            # v5e / v6e: 128 MiB physical
        return 56 * _MIB, 96 * _MIB, cap
    return 24 * _MIB, 40 * _MIB, cap                 # v7x: 64 MiB physical / unknown


def _pick_row_tile(ho, wo_pad, kc, cout_p, out_itemsize, budget_bytes):
    """Largest TH whose VMEM footprint (incl. f32 acc + double buffers) fits budget."""
    per_row = (2 * wo_pad * kc * 2                   # bf16 input tile, double-buffered
               + wo_pad * kc * 2                     # LHS headroom
               + 2 * wo_pad * cout_p * out_itemsize  # output tile, double-buffered
               + wo_pad * cout_p * 4)                # live f32 accumulator
    fixed = 2 * (kc * cout_p * 2) + 2 * (cout_p * 4)  # weights + bias (double-buffered)
    th = (budget_bytes - fixed) // max(per_row, 1)
    th = int(max(1, min(th, ho, 256)))
    if th >= 8:
        th = (th // 8) * 8
    est = fixed + per_row * th
    return th, est


@jax.jit
def downsample_forward(x, w, b):
    """x: [N, C, H, W]; w: [Cout, Cin, 3, 3]; b: [Cout].

    Returns [N, Cout, Ho, Wo] with Ho = (H+1)//2, Wo = (W+1)//2 — identical to
    nn.Conv2d(C, C, 3, stride=2, padding=1).  (The DDPM `t` arg is unused.)
    """
    N, C, H, W = x.shape
    Cout, Cin, KH, KW = w.shape
    assert (Cin, KH, KW) == (C, 3, 3)
    Ho, Wo = (H + 1) // 2, (W + 1) // 2

    Cout_p = ((Cout + 127) // 128) * 128             # lane-dense output stores
    Wo_pad = ((Wo + 15) // 16) * 16                  # bf16 sublane-exact width
    KC = 9 * C                                       # folded contraction dim

    budget, limit, cap = _vmem_config()
    TH, est = _pick_row_tile(Ho, Wo_pad, KC, Cout_p, x.dtype.itemsize, budget)
    # v7x has 2 TensorCores: make sure the parallel grid has at least 2 steps.
    if N == 1 and -(-Ho // TH) < 2 and Ho > 1:
        TH = -(-Ho // 2)
        if TH >= 8:
            TH = (TH // 8) * 8
    n_t = -(-Ho // TH)                               # cdiv
    Ho_pad = TH * n_t
    vmem_limit = max(limit, min(est + 8 * _MIB, cap - 2 * _MIB))

    # ---- wrapper glue: O(~2.25x input) HBM traffic, no in-kernel relayouts ------
    # TODO(synk): keep activations NHWC (and optionally bf16) across the model to
    # drop the NCHW<->NHWC transposes and the f32 output writeback.
    x_nhwc = jnp.transpose(x, (0, 2, 3, 1)).astype(jnp.bfloat16)
    pad_bot = 2 * Ho_pad - H
    pad_rgt = 2 * Wo_pad - W
    xpad = jnp.pad(x_nhwc, ((0, 0), (1, pad_bot), (1, pad_rgt), (0, 0)))

    # Tap (kh, kw) -> a clean [Ho_pad, Wo_pad, C] slice; concat along channels so
    # the kernel contracts over K = 9*C in a single matmul.
    taps = [xpad[:, kh:kh + 2 * Ho_pad:2, kw:kw + 2 * Wo_pad:2, :]
            for kh in range(3) for kw in range(3)]
    xcat = jnp.concatenate(taps, axis=-1)            # (N, Ho_pad, Wo_pad, 9*C)

    # Weights: (Cout, Cin, 3, 3) -> (9*Cin, Cout_p), row = (kh*3+kw)*Cin + ci.
    w_flat = jnp.transpose(w, (2, 3, 1, 0)).reshape(KC, Cout)
    w_flat = jnp.pad(w_flat, ((0, 0), (0, Cout_p - Cout))).astype(jnp.bfloat16)
    b_row = jnp.pad(b, (0, Cout_p - Cout)).reshape(1, Cout_p).astype(jnp.float32)

    flops = 2 * N * Ho_pad * Wo_pad * KC * Cout_p
    bytes_accessed = (N * Ho_pad * Wo_pad * KC * 2
                      + KC * Cout_p * 2 + Cout_p * 4
                      + N * Ho_pad * Wo_pad * Cout_p * x.dtype.itemsize)

    out_padded = pl.pallas_call(
        _downsample_kernel,
        out_shape=jax.ShapeDtypeStruct((N, Ho_pad, Wo_pad, Cout_p), x.dtype),
        grid_spec=pltpu.PrefetchScalarGridSpec(
            num_scalar_prefetch=0,
            grid=(N, n_t),
            in_specs=[
                pl.BlockSpec((1, TH, Wo_pad, KC), lambda n, t: (n, t, 0, 0)),
                pl.BlockSpec((KC, Cout_p), lambda n, t: (0, 0)),
                pl.BlockSpec((1, Cout_p), lambda n, t: (0, 0)),
            ],
            out_specs=pl.BlockSpec((1, TH, Wo_pad, Cout_p),
                                   lambda n, t: (n, t, 0, 0)),
        ),
        compiler_params=pltpu.CompilerParams(
            dimension_semantics=("parallel", "parallel"),
            vmem_limit_bytes=int(vmem_limit),
        ),
        cost_estimate=pl.CostEstimate(
            flops=flops, transcendentals=0, bytes_accessed=bytes_accessed),
    )(xcat, w_flat, b_row)

    # Drop padded rows / cols / channels; return NCHW to match the PyTorch API.
    out = out_padded[:, :Ho, :Wo, :Cout]
    return jnp.transpose(out, (0, 3, 1, 2))


if __name__ == "__main__":
    key = jax.random.PRNGKey(0)
    kx, kw, kb = jax.random.split(key, 3)

    N, C, H, W = 2, 4, 16, 16
    x = jax.random.normal(kx, (N, C, H, W), dtype=jnp.float32)

    # deterministic Conv2d-style init: U(-bound, bound), bound = 1/sqrt(fan_in)
    fan_in = C * 3 * 3
    bound = 1.0 / (fan_in ** 0.5)
    w = jax.random.uniform(kw, (C, C, 3, 3), jnp.float32, -bound, bound)
    b = jax.random.uniform(kb, (C,), jnp.float32, -bound, bound)

    y = downsample_forward(x, w, b)
    y = jax.block_until_ready(y)
    assert y.shape == (N, C, H // 2, W // 2), y.shape

    # reference check against XLA conv (same semantics as nn.Conv2d);
    # bf16 MXU operands with f32 accumulation -> loosened tolerance.
    y_ref = lax.conv_general_dilated(
        x, w, window_strides=(2, 2), padding=((1, 1), (1, 1)),
        dimension_numbers=("NCHW", "OIHW", "NCHW"),
    ) + b[None, :, None, None]
    err = float(jnp.max(jnp.abs(y - y_ref)))
    assert err < 3e-2, err

    print("KERNEL_OK")
</pallas_src>

<mosaic_0001>
module attributes {stable_mosaic.version = 11 : i64} {
  func.func @_downsample_kernel(%arg0: i32, %arg1: i32, %arg2: memref<1x8x16x36xbf16, #tpu.memory_space<vmem>>, %arg3: memref<36x128xbf16, #tpu.memory_space<vmem>>, %arg4: memref<1x128xf32, #tpu.memory_space<vmem>>, %arg5: memref<1x8x16x128xf32, #tpu.memory_space<vmem>>) attributes {dimension_semantics = [#tpu.dimension_semantics<parallel>, #tpu.dimension_semantics<parallel>], iteration_bounds = array<i64: 2, 1>, scalar_prefetch = 0 : i64, scratch_operands = 0 : i64, tpu.core_type = #tpu.core_type<tc>, window_params = [{transform_indices = @transform_0, window_bounds = array<i64: 1, 8, 16, 36>}, {pipeline_mode = #tpu.pipeline_mode<synchronous>, transform_indices = @transform_1, window_bounds = array<i64: 36, 128>}, {pipeline_mode = #tpu.pipeline_mode<synchronous>, transform_indices = @transform_2, window_bounds = array<i64: 1, 128>}, {transform_indices = @transform_3, window_bounds = array<i64: 1, 8, 16, 128>}]} {
    %c0 = arith.constant 0 : index
    %c0_0 = arith.constant 0 : index
    %c0_1 = arith.constant 0 : index
    %c0_2 = arith.constant 0 : index
    %0 = vector.load %arg2[%c0, %c0_0, %c0_1, %c0_2] : memref<1x8x16x36xbf16, #tpu.memory_space<vmem>>, vector<1x8x16x36xbf16>
    %1 = vector.shape_cast %0 : vector<1x8x16x36xbf16> to vector<8x16x36xbf16>
    %2 = vector.shape_cast %1 : vector<8x16x36xbf16> to vector<128x36xbf16>
    %c0_3 = arith.constant 0 : index
    %c0_4 = arith.constant 0 : index
    %3 = vector.load %arg3[%c0_3, %c0_4] : memref<36x128xbf16, #tpu.memory_space<vmem>>, vector<36x128xbf16>
    %cst = arith.constant dense<0.000000e+00> : vector<128x128xf32>
    %4 = tpu.matmul %2, %3, %cst {dimension_numbers = #tpu.dot_dimension_numbers<[1], [0], [0], [1], [0, 0, 1, 1], [], []>} : vector<128x36xbf16>, vector<36x128xbf16>, vector<128x128xf32> -> vector<128x128xf32>
    %c0_5 = arith.constant 0 : index
    %c0_6 = arith.constant 0 : index
    %5 = vector.load %arg4[%c0_5, %c0_6] : memref<1x128xf32, #tpu.memory_space<vmem>>, vector<1x128xf32>
    %6 = vector.broadcast %5 : vector<1x128xf32> to vector<128x128xf32>
    %7 = arith.addf %4, %6 : vector<128x128xf32>
    %8 = vector.shape_cast %7 : vector<128x128xf32> to vector<8x16x128xf32>
    %c0_7 = arith.constant 0 : index
    %c0_8 = arith.constant 0 : index
    %c0_9 = arith.constant 0 : index
    %c0_10 = arith.constant 0 : index
    %9 = vector.load %arg5[%c0_7, %c0_8, %c0_9, %c0_10] : memref<1x8x16x128xf32, #tpu.memory_space<vmem>>, vector<1x8x16x128xf32>
    %10 = vector.shape_cast %9 : vector<1x8x16x128xf32> to vector<8x16x128xf32>
    %11 = vector.shape_cast %8 : vector<8x16x128xf32> to vector<1x8x16x128xf32>
    tpu.vector_store %arg5[%c0_7, %c0_8, %c0_9, %c0_10], %11 {strides = array<i32>} : memref<1x8x16x128xf32, #tpu.memory_space<vmem>>, vector<1x8x16x128xf32>,
    return
  }
  func.func @transform_0(%arg0: i32, %arg1: i32) -> (i32, i32, i32, i32) {
    %c0_i32 = arith.constant 0 : i32
    %c0_i32_0 = arith.constant 0 : i32
    %c0_i32_1 = arith.constant 0 : i32
    return %arg0, %arg1, %c0_i32, %c0_i32_0 : i32, i32, i32, i32
  }
  func.func @transform_1(%arg0: i32, %arg1: i32) -> (i32, i32) {
    %c0_i32 = arith.constant 0 : i32
    %c0_i32_0 = arith.constant 0 : i32
    %c0_i32_1 = arith.constant 0 : i32
    return %c0_i32, %c0_i32_0 : i32, i32
  }
  func.func @transform_2(%arg0: i32, %arg1: i32) -> (i32, i32) {
    %c0_i32 = arith.constant 0 : i32
    %c0_i32_0 = arith.constant 0 : i32
    %c0_i32_1 = arith.constant 0 : i32
    return %c0_i32, %c0_i32_0 : i32, i32
  }
  func.func @transform_3(%arg0: i32, %arg1: i32) -> (i32, i32, i32, i32) {
    %c0_i32 = arith.constant 0 : i32
    %c0_i32_0 = arith.constant 0 : i32
    %c0_i32_1 = arith.constant 0 : i32
    return %arg0, %arg1, %c0_i32, %c0_i32_0 : i32, i32, i32, i32
  }
}

</mosaic_0001>

<bundles_post_ra>
// kernel: downsample_forward.1
= control target key start
LH: loop header
LB: loop body
LE: loop exit
PB: predicated region body
PF: predicated region fallthrough
CT: control target
= control target key end

     0   :  { %s690_s12 = smov 0   ;;  %s692_s13 = smov 0   ;;  %s765_s0 = inlined_call_operand.vmem [shape: bf16[2,8,16,36], index: 0, kind: input, shape index: {}]   ;;  %s766_s1 = inlined_call_operand.vmem [shape: bf16[36,128], index: 1, kind: input, shape index: {}]   ;;  %s767_s2 = inlined_call_operand.vmem [shape: f32[1,128], index: 2, kind: input, shape index: {}]   ;;  %s768_s3 = inlined_call_operand.vmem [shape: f32[2,8,16,128], index: 3, kind: output, shape index: {}]  }
   0x1   :  { %s694_s14 = smov 0  }
   0x2 LB: > { %s25_s15 = sadd.s32 1, %s664_s13  ;;  %p541_p0 = scmp.ge.s32.totalorder %s668_s14, 1  ;;  %s668_s14 = sphi %s694_s14, %s13_s14   ;;  %s664_s13 = sphi %s692_s13, %s770_s13   ;;  %s660_s12 = sphi %s690_s12, %s769_s12  }
   0x3   : > { %p27_p1 = scmp.ge.s32.totalorder %s25_s15, 2  ;;  %p159_p2 = scmp.lt.s32.totalorder %s668_s14, 3 }
   0x5   : > { %s772_s15 = smov (%p27_p1, %s25_s15), 0  ;;  %p160_p3 = pnand %p541_p0, %p159_p2 }
   0x6   : > { %p194_p4 = scmp.lt.s32.totalorder (!%p160_p3), %s660_s12, 1 }
   0x7   : > { %163 = sbr.rel (%p160_p3) target bundleno = 235 (0xeb), region = 32 }
   0xc   : > { %v635_v0 = vld [vmem:[%s766_s1 + $0x10] ss:$0 sps:$4 sm:$0x33]   ;;  %vm324_vm0 = vcmask 1041408   ;;  %v636_v1 = vld [vmem:[%s766_s1 + $0x8] sm:$0xff]   ;;  %s774_s12 = smov (!%p194_p4, %s660_s12), 1 }
   0xd   : > { %609 = vmatprep.subr.msk.bf16.mxu0 %vm324_vm0, %v635_v0  ;;  %610 = vmatprep.subr.msk.bf16.mxu1 %vm324_vm0, %v635_v0  ;;  %v326_v2 = vsel %vm324_vm0, %v635_v0, 0  ;;  %v637_v3 = vld [vmem:[%s766_s1] sm:$0xff]   ;;  %s568_s22 = sshll.u32 %s774_s12, 6  ;;  %vm299_vm1 = vcmask 293888   ;;  %s569_s26 = sshll.u32 %s774_s12, 7 }
   0xe   : > { %582 = vmatpush3.bf16.msra.mxu0 %v326_v2  ;;  %606 = vmatpush3.bf16.msra.mxu1 %v326_v2  ;;  %s202_s25 = scalar_lea.vmem %s765_s0, %s568_s22  ;;  %v546_v12 = vld [vmem:[%s767_s2] ss:$0 sm:$0xff]  ;;  %s738_s4 = scalar_lea.vmem %s768_s3, %s569_s26 }
   0xf   : > { %583 = vmatprep.subr.bf16.mxu0 %v636_v1  ;;  %604 = vmatprep.subr.bf16.mxu1 %v636_v1  ;;  %v638_v4 = vld [vmem:[%s202_s25] sm:$0xff]   ;;  %v640_v6 = vld [vmem:[%s202_s25 + $0x8] sm:$0xff]   ;;  %v642_v8 = vld [vmem:[%s202_s25 + $0x10] sm:$0xff]  }
  0x10   : > { %v639_v5 = vld [vmem:[%s202_s25 + $0x20] sm:$0xff]   ;;  %587 = vmatprep.mubr.msk.bf16.mxu0 %vm299_vm1, %v638_v4  ;;  %v641_v7 = vld [vmem:[%s202_s25 + $0x28] sm:$0xff]   ;;  %v643_v9 = vld [vmem:[%s202_s25 + $0x30] sm:$0xff]  }
  0x11   : > { %595 = vmatprep.mubr.msk.bf16.mxu1 %vm299_vm1, %v639_v5  ;;  %v644_v10 = vld [vmem:[%s202_s25 + $0x18] sm:$0xff]  }
  0x12   : > { %584 = vmatpush3.bf16.msra.mxu0 %v636_v1  ;;  %607 = vmatpush3.bf16.msra.mxu1 %v636_v1  ;;  %v645_v11 = vld [vmem:[%s202_s25 + $0x38] sm:$0xff]  }
  0x13   : > { %585 = vmatprep.subr.bf16.mxu0 %v637_v3  ;;  %605 = vmatprep.subr.bf16.mxu1 %v637_v3 }
  0x16   : > { %586 = vmatpush3.bf16.msra.mxu0 %v637_v3  ;;  %608 = vmatpush3.bf16.msra.mxu1 %v637_v3 }
  0x19   : > { %588 = vmatmul.mubr.msk.bf16.vlgmr.msra.gmra.mxu0 %vm299_vm1, %v640_v6  ;;  %596 = vmatmul.mubr.msk.bf16.vlgmr.msra.gmra.mxu1 %vm299_vm1, %v641_v7 }
  0x1a   : > { %591 = vmatprep.mubr.msk.bf16.mxu0 %vm299_vm1, %v642_v8  ;;  %599 = vmatprep.mubr.msk.bf16.mxu1 %vm299_vm1, %v643_v9 }
  0x21   : > { %592 = vmatmul.mubr.msk.bf16.gmra.mxu0 %vm299_vm1, %v644_v10  ;;  %600 = vmatmul.mubr.msk.bf16.gmra.mxu1 %vm299_vm1, %v645_v11 }
  0xd9   : > { %v589_v13 = vpop.f32.mrf.mxu0  ;;  %v597_v14 = vpop.f32.mrf.mxu1 }
  0xda   : > { %v371_v15 = vadd.f32 %v589_v13, %v546_v12  ;;  %v403_v16 = vadd.f32 %v597_v14, %v546_v12 }
  0xdb   : > { %v362_v17 = vpop.f32.mrf.mxu0  ;;  %v394_v18 = vpop.f32.mrf.mxu1 }
  0xdc   : > { %427 = vst [vmem:[%s738_s4 + $0x10] sm:$0xff] %v371_v15  ;;  %435 = vst [vmem:[%s738_s4 + $0x50] sm:$0xff] %v403_v16  ;;  %v363_v19 = vadd.f32 %v546_v12, %v362_v17  ;;  %v395_v20 = vadd.f32 %v546_v12, %v394_v18 }
  0xdd   : > { %v590_v21 = vpop.f32.mrf.mxu0  ;;  %v598_v22 = vpop.f32.mrf.mxu1 }
  0xde   : > { %425 = vst [vmem:[%s738_s4] sm:$0xff] %v363_v19  ;;  %433 = vst [vmem:[%s738_s4 + $0x40] sm:$0xff] %v395_v20  ;;  %v374_v23 = vadd.f32 %v590_v21, %v546_v12  ;;  %v406_v24 = vadd.f32 %v598_v22, %v546_v12 }
  0xdf   : > { %v365_v25 = vpop.f32.mrf.mxu0  ;;  %v397_v26 = vpop.f32.mrf.mxu1 }
  0xe0   : > { %428 = vst [vmem:[%s738_s4 + $0x18] sm:$0xff] %v374_v23  ;;  %436 = vst [vmem:[%s738_s4 + $0x58] sm:$0xff] %v406_v24  ;;  %v366_v27 = vadd.f32 %v546_v12, %v365_v25  ;;  %v398_v28 = vadd.f32 %v546_v12, %v397_v26 }
  0xe1   : > { %v593_v29 = vpop.f32.mrf.mxu0  ;;  %v601_v30 = vpop.f32.mrf.mxu1 }
  0xe2   : > { %426 = vst [vmem:[%s738_s4 + $0x8] sm:$0xff] %v366_v27  ;;  %434 = vst [vmem:[%s738_s4 + $0x48] sm:$0xff] %v398_v28  ;;  %v387_v31 = vadd.f32 %v593_v29, %v546_v12  ;;  %v419_v32 = vadd.f32 %v601_v30, %v546_v12 }
  0xe3   : > { %v378_v33 = vpop.f32.mrf.mxu0  ;;  %v410_v34 = vpop.f32.mrf.mxu1 }
  0xe4   : > { %431 = vst [vmem:[%s738_s4 + $0x30] sm:$0xff] %v387_v31  ;;  %439 = vst [vmem:[%s738_s4 + $0x70] sm:$0xff] %v419_v32  ;;  %v379_v35 = vadd.f32 %v546_v12, %v378_v33  ;;  %v411_v36 = vadd.f32 %v546_v12, %v410_v34 }
  0xe5   : > { %v594_v37 = vpop.f32.mrf.mxu0  ;;  %v602_v38 = vpop.f32.mrf.mxu1 }
  0xe6   : > { %429 = vst [vmem:[%s738_s4 + $0x20] sm:$0xff] %v379_v35  ;;  %437 = vst [vmem:[%s738_s4 + $0x60] sm:$0xff] %v411_v36  ;;  %v390_v39 = vadd.f32 %v594_v37, %v546_v12  ;;  %v422_v40 = vadd.f32 %v602_v38, %v546_v12 }
  0xe7   : > { %v381_v41 = vpop.f32.mrf.mxu0  ;;  %v413_v42 = vpop.f32.mrf.mxu1 }
  0xe8   : > { %432 = vst [vmem:[%s738_s4 + $0x38] sm:$0xff] %v390_v39  ;;  %440 = vst [vmem:[%s738_s4 + $0x78] sm:$0xff] %v422_v40  ;;  %v382_v43 = vadd.f32 %v546_v12, %v381_v41  ;;  %v414_v44 = vadd.f32 %v546_v12, %v413_v42 }
  0xea   : > { %430 = vst [vmem:[%s738_s4 + $0x28] sm:$0xff] %v382_v43  ;;  %438 = vst [vmem:[%s738_s4 + $0x68] sm:$0xff] %v414_v44 }
  0xeb PF: > { %s13_s14 = sadd.s32 1, %s668_s14   ;;  %s769_s12 = smov %s664_s13 }
  0xec   : > { %p10_p5 = scmp.ge.s32.totalorder %s13_s14, 4   ;;  %s770_s13 = smov %s772_s15 }
  0xee   :  { %12 = sbr.rel (!%p10_p5) target bundleno = 2 (0x2), region = 62 }

</bundles_post_ra>
